<compile_context>
chip_gen: v7x
topology: tpu7x:2x2x1
jax: 0.10.0
libtpu: 0.0.40
codegen_flags: <defaults>
</compile_context>

<pallas_src>
import functools

import jax
import jax.numpy as jnp
from jax.experimental import pallas as pl
from jax.experimental.pallas import tpu as pltpu


def _round_up(x, m):
    return ((x + m - 1) // m) * m


def _ffn_kernel_scratch(x_ref, w1_ref, w2_ref, o_ref, acc_ref):
    """Variant with an f32 VMEM accumulator (used when output dtype != f32)."""
    # x_ref : (tm, D)    tile of input rows        (resident across k)
    # w1_ref: (D, tdm)   k-th column block of w1   (streamed)
    # w2_ref: (tdm, D)   k-th row block of w2      (streamed)
    # o_ref : (tm, D)    output tile (written on last k)
    # acc_ref: (tm, D)   f32 accumulator scratch
    k = pl.program_id(1)

    @pl.when(k == 0)
    def _():
        acc_ref[...] = jnp.zeros_like(acc_ref)

    h = jnp.dot(x_ref[...], w1_ref[...], preferred_element_type=jnp.float32)
    h = h * jax.nn.sigmoid(h)  # silu
    acc_ref[...] += jnp.dot(h.astype(w2_ref.dtype), w2_ref[...],
                            preferred_element_type=jnp.float32)

    @pl.when(k == pl.num_programs(1) - 1)
    def _():
        o_ref[...] = acc_ref[...].astype(o_ref.dtype)


def _ffn_kernel_f32_out(x_ref, w1_ref, w2_ref, o_ref):
    """Variant that accumulates directly into the resident f32 output tile."""
    k = pl.program_id(1)

    @pl.when(k == 0)
    def _():
        o_ref[...] = jnp.zeros_like(o_ref)

    h = jnp.dot(x_ref[...], w1_ref[...], preferred_element_type=jnp.float32)
    h = h * jax.nn.sigmoid(h)  # silu
    o_ref[...] += jnp.dot(h.astype(w2_ref.dtype), w2_ref[...],
                          preferred_element_type=jnp.float32)


@functools.partial(jax.jit, static_argnames=("tm", "tdm", "compute_dtype"))
def ffn_pallas(x, w1, w2, *, tm=512, tdm=512, compute_dtype=None):
    """x: (B, S, D); w1: (D, Dm); w2: (Dm, D)  ->  (B, S, D)."""
    B, S, D = x.shape
    Dm = w1.shape[1]
    M = B * S
    out_dtype = x.dtype

    # Optional bf16 compute path (halves the weight HBM stream); accumulation
    # stays f32 via preferred_element_type.  Off by default for f32 parity.
    if compute_dtype is not None:
        x = x.astype(compute_dtype)
        w1 = w1.astype(compute_dtype)
        w2 = w2.astype(compute_dtype)

    in_itm = jnp.dtype(x.dtype).itemsize
    out_itm = jnp.dtype(out_dtype).itemsize
    row_align = 16 if in_itm == 2 else 8  # sublane packing

    # ---- device VMEM budget (v7x: 64 MiB, v5e/v6e: 128 MiB) ----
    try:
        dev_vmem = int(pltpu.get_tpu_info().vmem_capacity_bytes)
    except Exception:
        dev_vmem = 64 << 20  # conservative fallback (v7x)
    budget = max(dev_vmem - (16 << 20), 32 << 20)

    # ---- row tile: as large as possible, but keep >= 2 tiles for megacore ----
    tm_ = _round_up(min(tm, _round_up(M, row_align)), row_align)
    if _round_up(M, tm_) // tm_ < 2 and M > row_align:
        tm_ = _round_up((M + 1) // 2, row_align)

    # ---- mid-dim tile (lane-aligned) ----
    tdm_ = _round_up(min(tdm, _round_up(Dm, 128)), 128)

    use_scratch = out_dtype != jnp.float32

    def vmem_bytes(tm__, tdm__):
        x_buf = 1 * tm__ * D * in_itm                    # single-buffered x
        w_buf = 2 * (D * tdm__ + tdm__ * D) * in_itm     # double-buffered w1/w2
        o_buf = 2 * tm__ * D * out_itm
        acc = tm__ * D * 4 if use_scratch else 0
        return x_buf + w_buf + o_buf + acc + (2 << 20)   # slack

    # Fit the budget: shrink tdm first (no HBM-traffic change), then tm.
    while vmem_bytes(tm_, tdm_) > budget and tdm_ > 128:
        tdm_ -= 128
    while vmem_bytes(tm_, tdm_) > budget and tm_ > row_align:
        tm_ = max(row_align, _round_up(tm_ // 2, row_align))

    # ---- pad (exact: zero rows / zero mid-dim columns contribute nothing) ----
    M_pad = _round_up(M, tm_)
    Dm_pad = _round_up(Dm, tdm_)

    x2d = x.reshape(M, D)
    if M_pad != M:
        x2d = jnp.pad(x2d, ((0, M_pad - M), (0, 0)))
    if Dm_pad != Dm:
        w1 = jnp.pad(w1, ((0, 0), (0, Dm_pad - Dm)))
        w2 = jnp.pad(w2, ((0, Dm_pad - Dm), (0, 0)))

    grid = (M_pad // tm_, Dm_pad // tdm_)

    vmem_est = vmem_bytes(tm_, tdm_)
    vmem_limit = int(min(dev_vmem - (8 << 20),
                         max(vmem_est + (4 << 20), 32 << 20)))
    vmem_limit = max(vmem_limit, vmem_est)

    cost = pl.CostEstimate(
        flops=4 * M * D * Dm,
        transcendentals=M * Dm,
        bytes_accessed=(M_pad * D * in_itm
                        + grid[0] * (D * Dm_pad + Dm_pad * D) * in_itm
                        + M_pad * D * out_itm),
    )

    in_specs = [
        # x rows: block index constant along k -> single buffer to save VMEM.
        pl.BlockSpec((tm_, D), lambda i, k: (i, 0),
                     pipeline_mode=pl.Buffered(1)),
        pl.BlockSpec((D, tdm_), lambda i, k: (0, k)),   # w1 column block
        pl.BlockSpec((tdm_, D), lambda i, k: (k, 0)),   # w2 row block
    ]
    out_spec = pl.BlockSpec((tm_, D), lambda i, k: (i, 0))

    if use_scratch:
        kernel = _ffn_kernel_scratch
        scratch_shapes = [pltpu.VMEM((tm_, D), jnp.float32)]
    else:
        kernel = _ffn_kernel_f32_out
        scratch_shapes = []

    out2d = pl.pallas_call(
        kernel,
        out_shape=jax.ShapeDtypeStruct((M_pad, D), out_dtype),
        grid_spec=pltpu.PrefetchScalarGridSpec(
            num_scalar_prefetch=0,
            grid=grid,
            in_specs=in_specs,
            out_specs=out_spec,
            scratch_shapes=scratch_shapes,
        ),
        compiler_params=pltpu.CompilerParams(
            dimension_semantics=("parallel", "arbitrary"),
            vmem_limit_bytes=vmem_limit,
        ),
        cost_estimate=cost,
    )(x2d, w1, w2)

    return out2d[:M].reshape(B, S, D)


def ffn_reference(x, w1, w2):
    h = jnp.dot(x, w1, preferred_element_type=jnp.float32)
    h = h * jax.nn.sigmoid(h)
    return jnp.dot(h.astype(w2.dtype), w2,
                   preferred_element_type=jnp.float32).astype(x.dtype)


if __name__ == "__main__":
    # Small shapes consistent with the module: batch=2, seq=8,
    # embed_dim=32, mid_dim=64, bias=False, activation="silu".
    B, S, D, Dm = 2, 8, 32, 64

    key = jax.random.PRNGKey(0)
    kx, k1, k2 = jax.random.split(key, 3)

    x = jax.random.normal(kx, (B, S, D), dtype=jnp.float32)
    # Deterministic synthetic weights (uniform, nn.Linear-like scale),
    # pre-transposed: w1 (D, Dm), w2 (Dm, D).
    w1 = jax.random.uniform(k1, (D, Dm), dtype=jnp.float32,
                            minval=-(D ** -0.5), maxval=D ** -0.5)
    w2 = jax.random.uniform(k2, (Dm, D), dtype=jnp.float32,
                            minval=-(Dm ** -0.5), maxval=Dm ** -0.5)

    out = ffn_pallas(x, w1, w2)
    out = jax.block_until_ready(out)

    ref = ffn_reference(x, w1, w2)
    assert out.shape == ref.shape, "shape mismatch vs reference"
    assert jnp.allclose(out, ref, atol=1e-5, rtol=1e-5), "mismatch vs reference"

    print("KERNEL_OK")
</pallas_src>

<mosaic_0001>
module attributes {stable_mosaic.version = 11 : i64} {
  func.func @_ffn_kernel_f32_out(%arg0: i32, %arg1: i32, %arg2: memref<8x32xf32, #tpu.memory_space<vmem>>, %arg3: memref<32x128xf32, #tpu.memory_space<vmem>>, %arg4: memref<128x32xf32, #tpu.memory_space<vmem>>, %arg5: memref<8x32xf32, #tpu.memory_space<vmem>>) attributes {dimension_semantics = [#tpu.dimension_semantics<parallel>, #tpu.dimension_semantics<arbitrary>], iteration_bounds = array<i64: 2, 1>, scalar_prefetch = 0 : i64, scratch_operands = 0 : i64, tpu.core_type = #tpu.core_type<tc>, window_params = [{pipeline_mode = #tpu.pipeline_mode<synchronous>, transform_indices = @transform_0, window_bounds = array<i64: 8, 32>}, {transform_indices = @transform_1, window_bounds = array<i64: 32, 128>}, {transform_indices = @transform_2, window_bounds = array<i64: 128, 32>}, {transform_indices = @transform_3, window_bounds = array<i64: 8, 32>}]} {
    %c0_i32 = arith.constant 0 : i32
    %0 = arith.cmpi eq, %arg1, %c0_i32 : i32
    %1 = arith.extui %0 : i1 to i32
    %c0_i32_0 = arith.constant 0 : i32
    %2 = arith.cmpi ne, %1, %c0_i32_0 : i32
    scf.if %2 {
      %cst_12 = arith.constant 0.000000e+00 : f32
      %17 = vector.broadcast %cst_12 : f32 to vector<8x32xf32>
      %c0_13 = arith.constant 0 : index
      %c0_14 = arith.constant 0 : index
      %18 = vector.load %arg5[%c0_13, %c0_14] : memref<8x32xf32, #tpu.memory_space<vmem>>, vector<8x32xf32>
      tpu.vector_store %arg5[%c0_13, %c0_14], %17 {strides = array<i32>} : memref<8x32xf32, #tpu.memory_space<vmem>>, vector<8x32xf32>,
    } else {
    }
    %c0 = arith.constant 0 : index
    %c0_1 = arith.constant 0 : index
    %3 = vector.load %arg2[%c0, %c0_1] : memref<8x32xf32, #tpu.memory_space<vmem>>, vector<8x32xf32>
    %c0_2 = arith.constant 0 : index
    %c0_3 = arith.constant 0 : index
    %4 = vector.load %arg3[%c0_2, %c0_3] : memref<32x128xf32, #tpu.memory_space<vmem>>, vector<32x128xf32>
    %cst = arith.constant dense<0.000000e+00> : vector<8x128xf32>
    %5 = tpu.matmul %3, %4, %cst {dimension_numbers = #tpu.dot_dimension_numbers<[1], [0], [0], [1], [0, 0, 1, 1], [], []>} : vector<8x32xf32>, vector<32x128xf32>, vector<8x128xf32> -> vector<8x128xf32>
    %6 = arith.negf %5 : vector<8x128xf32>
    %7 = math.exp %6 : vector<8x128xf32>
    %cst_4 = arith.constant 1.000000e+00 : f32
    %8 = vector.broadcast %cst_4 : f32 to vector<8x128xf32>
    %9 = arith.addf %8, %7 : vector<8x128xf32>
    %10 = arith.divf %8, %9 : vector<8x128xf32>
    %11 = arith.mulf %5, %10 : vector<8x128xf32>
    %c0_5 = arith.constant 0 : index
    %c0_6 = arith.constant 0 : index
    %12 = vector.load %arg5[%c0_5, %c0_6] : memref<8x32xf32, #tpu.memory_space<vmem>>, vector<8x32xf32>
    %c0_7 = arith.constant 0 : index
    %c0_8 = arith.constant 0 : index
    %13 = vector.load %arg4[%c0_7, %c0_8] : memref<128x32xf32, #tpu.memory_space<vmem>>, vector<128x32xf32>
    %cst_9 = arith.constant dense<0.000000e+00> : vector<8x32xf32>
    %14 = tpu.matmul %11, %13, %cst_9 {dimension_numbers = #tpu.dot_dimension_numbers<[1], [0], [0], [1], [0, 0, 1, 1], [], []>} : vector<8x128xf32>, vector<128x32xf32>, vector<8x32xf32> -> vector<8x32xf32>
    %15 = arith.addf %12, %14 : vector<8x32xf32>
    %c0_10 = arith.constant 0 : index
    %c0_11 = arith.constant 0 : index
    %16 = vector.load %arg5[%c0_10, %c0_11] : memref<8x32xf32, #tpu.memory_space<vmem>>, vector<8x32xf32>
    tpu.vector_store %arg5[%c0_10, %c0_11], %15 {strides = array<i32>} : memref<8x32xf32, #tpu.memory_space<vmem>>, vector<8x32xf32>,
    return
  }
  func.func @transform_0(%arg0: i32, %arg1: i32) -> (i32, i32) {
    %c0_i32 = arith.constant 0 : i32
    %c0_i32_0 = arith.constant 0 : i32
    return %arg0, %c0_i32 : i32, i32
  }
  func.func @transform_1(%arg0: i32, %arg1: i32) -> (i32, i32) {
    %c0_i32 = arith.constant 0 : i32
    %c0_i32_0 = arith.constant 0 : i32
    return %c0_i32, %arg1 : i32, i32
  }
  func.func @transform_2(%arg0: i32, %arg1: i32) -> (i32, i32) {
    %c0_i32 = arith.constant 0 : i32
    %c0_i32_0 = arith.constant 0 : i32
    return %arg1, %c0_i32 : i32, i32
  }
  func.func @transform_3(%arg0: i32, %arg1: i32) -> (i32, i32) {
    %c0_i32 = arith.constant 0 : i32
    %c0_i32_0 = arith.constant 0 : i32
    return %arg0, %c0_i32 : i32, i32
  }
}

</mosaic_0001>

<bundles_post_ra>
// kernel: ffn_pallas.1
= control target key start
LH: loop header
LB: loop body
LE: loop exit
PB: predicated region body
PF: predicated region fallthrough
CT: control target
= control target key end

     0   :  { %8 = vsyncpa [#allocation3], 0  ;;  %s975_s0 = inlined_call_operand.vmem [shape: f32[16,32], index: 0, kind: input, shape index: {}]   ;;  %s976_s1 = inlined_call_operand.vmem [shape: f32[32,128], index: 1, kind: input, shape index: {}]   ;;  %s977_s2 = inlined_call_operand.vmem [shape: f32[128,32], index: 2, kind: input, shape index: {}]   ;;  %s978_s3 = inlined_call_operand.hbm [shape: f32[16,32], index: 3, kind: output, shape index: {}]  }
   0x1   :  { %10 = vsyncpa [#allocation3 + $0x1], 0  ;;  %s790_s12 = smov 0   ;;  %s792_s13 = smov 0  }
   0x2   :  { %s794_s14 = smov 0   ;;  %s796_s15 = smov 0  }
   0x3   :  { %s798_s16 = smov 0   ;;  %s800_s17 = smov 0  }
   0x4 LB: > { %s512_s18 = sadd.s32 4294967295, %s764_s17   ;;  %s513_s19 = sadd.s32 4294967294, %s764_s17   ;;  %s764_s17 = sphi %s800_s17, %s16_s17   ;;  %s760_s16 = sphi %s798_s16, %s985_s16   ;;  %s756_s15 = sphi %s796_s15, %s984_s15   ;;  %s752_s14 = sphi %s794_s14, %s983_s14   ;;  %s748_s13 = sphi %s792_s13, %s982_s13   ;;  %s744_s12 = sphi %s790_s12, %s981_s12  }
   0x5   : > { %s28_s20 = sadd.s32 1, %s760_s16  ;;  %s113_s21 = sadd.s32 1, %s752_s14 }
   0x6   : > { %p30_p0 = scmp.ge.s32.totalorder %s28_s20, 2  ;;  %p123_p1 = scmp.ne.s32.totalorder %s752_s14, %s748_s13 }
   0x7   : > { %p124_p2 = scmp.eq.s32.totalorder %s512_s18, 1  ;;  %p129_p3 = scmp.ne.s32.totalorder %s748_s13, %s744_s12 }
   0x8   : > { %s987_s20 = smov (%p30_p0, %s28_s20), 0  ;;  %p130_p5 = scmp.eq.s32.totalorder %s513_s19, 1 }
   0x9   : > { %p830_p4 = por %p124_p2, %p123_p1  ;;  %s110_s23 = ssub.s32 %s760_s16, %s987_s20 }
   0xa   : > { %p517_p6 = scmp.ge.s32.totalorder %s764_s17, 1  ;;  %p111_p7 = scmp.eq.s32.totalorder %s110_s23, 0 }
   0xb   : > { %p837_p8 = por %p130_p5, %p129_p3  ;;  %p171_p9 = scmp.lt.s32.totalorder %s764_s17, 3 }
   0xc   : > { %s843_s25 = scalar_select %p111_p7, %s752_s14, %s113_s21  }
   0xd   : > { %p172_p10 = pnand %p517_p6, %p171_p9 }
   0xe   : > { %v224_v0 = vld [vmem:[%s976_s1] sm:$0xff] (!%p172_p10)  ;;  %v225_v1 = vld [vmem:[%s976_s1 + $0x8] sm:$0xff] (!%p172_p10)  ;;  %v226_v2 = vld [vmem:[%s976_s1 + $0x10] sm:$0xff] (!%p172_p10)  ;;  %v766_v3 = vmov (!%p172_p10), 0.0|0.0   ;;  %vm767_vm0 = vmmov (!%p172_p10), 0   ;;  %v768_v6 = vmov (!%p172_p10), 0.0  }
   0xf   : > { %175 = sbr.rel (%p172_p10) target bundleno = 495 (0x1ef), region = 32  ;;  %594 = vmatprep.subr.bf16.mxu0 (!%p172_p10), %v766_v3  ;;  %v595_v4 = vpack.c.bf16 (!%p172_p10), %v225_v1, %v224_v0  ;;  %v227_v5 = vld [vmem:[%s976_s1 + $0x18] sm:$0xff] (!%p172_p10)  ;;  %556 = vmatprep.mubr.msk.f32.mxu0 (!%p172_p10), %vm767_vm0, %v768_v6  ;;  %s200_s7 = sand.u32 (!%p172_p10), 1, %s748_s13   ;;  %v310_v7 = vld [vmem:[%s977_s2] sm:$0xff] (!%p172_p10)  ;;  %v311_v8 = vld [vmem:[%s977_s2 + $0x8] sm:$0xff] (!%p172_p10)  ;;  %vm221_vm1 = vcmask (!%p172_p10), 261120  }
  0x10   : > { %p203_p11 = scmp.lt.s32.totalorder (!%p172_p10), %s756_s15, 1  ;;  %s518_s18 = sshll.u32 (!%p172_p10), %s200_s7, 3  ;;  %600 = vmatprep.subr.bf16.mxu1 (!%p172_p10), %v766_v3  ;;  %v601_v9 = vpack.c.bf16 (!%p172_p10), %v311_v8, %v310_v7  ;;  %591 = vmatprep.mubr.msk.f32.mxu1 (!%p172_p10), %vm767_vm0, %v768_v6  ;;  %v598_v10 = vpack.c.bf16 (!%p172_p10), %v227_v5, %v226_v2  ;;  %v312_v12 = vld [vmem:[%s977_s2 + $0x10] sm:$0xff] (!%p172_p10)  ;;  %v313_v13 = vld [vmem:[%s977_s2 + $0x18] sm:$0xff] (!%p172_p10)  ;;  %v314_v15 = vld [vmem:[%s977_s2 + $0x20] sm:$0xff] (!%p172_p10) }
  0x11   : > { %596 = vmatpush3.bf16.msra.mxu0 (!%p172_p10), %v595_v4  ;;  %s868_s21 = scalar_lea.vmem (!%p172_p10), [#allocation2], %s518_s18  ;;  %v604_v14 = vpack.c.bf16 (!%p172_p10), %v313_v13, %v312_v12  ;;  %v315_v16 = vld [vmem:[%s977_s2 + $0x28] sm:$0xff] (!%p172_p10)  ;;  %v316_v18 = vld [vmem:[%s977_s2 + $0x30] sm:$0xff] (!%p172_p10)  ;;  %v317_v19 = vld [vmem:[%s977_s2 + $0x38] sm:$0xff] (!%p172_p10)  ;;  %s523_s27 = sshll.u32 (!%p172_p10), %s756_s15, 7 }
  0x12   : > { %597 = vmatprep.subr.bf16.mxu0 (!%p172_p10), %v766_v3  ;;  %222 = vst.msk [vmem:[%s868_s21] sm:$0xff] (!%p172_p10), %vm221_vm1, %v768_v6  ;;  %602 = vmatpush3.bf16.msra.mxu1 (!%p172_p10), %v601_v9  ;;  %v607_v17 = vpack.c.bf16 (!%p172_p10), %v315_v16, %v314_v15  ;;  %v610_v20 = vpack.c.bf16 (!%p172_p10), %v317_v19, %v316_v18  ;;  %v318_v21 = vld [vmem:[%s977_s2 + $0x40] sm:$0xff] (!%p172_p10)  ;;  %v319_v22 = vld [vmem:[%s977_s2 + $0x48] sm:$0xff] (!%p172_p10)  ;;  %v320_v24 = vld [vmem:[%s977_s2 + $0x50] sm:$0xff] (!%p172_p10)  ;;  %s924_s4 = scalar_lea.hbm (!%p172_p10), %s978_s3, %s523_s27  ;;  %s399_s5 = scalar_lea.sflag (!%p172_p10), [#allocation3], %s200_s7 }
  0x13   : > { %603 = vmatprep.subr.bf16.mxu1 (!%p172_p10), %v766_v3  ;;  %v613_v23 = vpack.c.bf16 (!%p172_p10), %v319_v22, %v318_v21  ;;  %v321_v25 = vld [vmem:[%s977_s2 + $0x58] sm:$0xff] (!%p172_p10)  ;;  %v322_v27 = vld [vmem:[%s977_s2 + $0x60] sm:$0xff] (!%p172_p10)  ;;  %v323_v28 = vld [vmem:[%s977_s2 + $0x68] sm:$0xff] (!%p172_p10) }
  0x14   : > { %v616_v26 = vpack.c.bf16 (!%p172_p10), %v321_v25, %v320_v24  ;;  %v619_v29 = vpack.c.bf16 (!%p172_p10), %v323_v28, %v322_v27  ;;  %v324_v30 = vld [vmem:[%s977_s2 + $0x70] sm:$0xff] (!%p172_p10)  ;;  %v325_v31 = vld [vmem:[%s977_s2 + $0x78] sm:$0xff] (!%p172_p10) }
  0x15   : > { %599 = vmatpush3.bf16.msra.mxu0 (!%p172_p10), %v598_v10  ;;  %v622_v32 = vpack.c.bf16 (!%p172_p10), %v325_v31, %v324_v30 }
  0x16   : > { %s204_s19 = scalar_select %p203_p11, %s756_s15, 1  ;;  %605 = vmatpush3.bf16.msra.mxu1 %v604_v14 }
  0x17   : > { %606 = vmatprep.subr.bf16.mxu1 %v766_v3  ;;  %s769_s15 = smov [#allocation2]  }
  0x18   : > { %s519_s23 = sshll.u32 %s204_s19, 3  ;;  %s690_s8 = sshll.u32 %s769_s15, 4  ;;  %s691_s8 = int_to_ptr.vmem [resolvable:$false] %s690_s8 }
  0x19   : > { %s206_s28 = scalar_lea.vmem %s975_s0, %s519_s23  ;;  %v309_v40 = vld [vmem:[%s868_s21] sm:$0xff]  ;;  %s692_s9 = scalar_lea.vmem %s691_s8, 256 }
  0x1a   : > { %v223_v11 = vld [vmem:[%s206_s28] sm:$0xff]  ;;  %608 = vmatpush3.bf16.msra.mxu1 %v607_v17  ;;  %s412_s28 = sshll.u32 %s868_s21, 4  ;;  %s926_s28 = int_to_ptr.vmem [resolvable:$true] %s412_s28 }
  0x1b   : > { %557 = vmatmul.mubr.msk.f32.vlgmr.msra.gmra.mrb[0].mxu0 %vm221_vm1, %v223_v11  ;;  %609 = vmatprep.subr.bf16.mxu1 %v766_v3  ;;  %s686_s6 = scalar_lea.vmem %s926_s28, 128  ;;  %p693_p1 = scmp.lt.s32.totalorder %s926_s28, %s691_s8 }
  0x1c   : > { %p687_p12 = scmp.ne.s32.totalorder %s926_s28, %s686_s6  ;;  %p694_p2 = scmp.lt.s32.totalorder %s692_s9, %s686_s6 }
  0x1e   : > { %611 = vmatpush3.bf16.msra.mxu1 %v610_v20  ;;  %p688_p13 = pnand %p687_p12, %p830_p4  ;;  %p695_p3 = por %p694_p2, %p693_p1 }
  0x1f   : > { %612 = vmatprep.subr.bf16.mxu1 %v766_v3 }
  0x20   : > { %p689_p0 = pneg %p688_p13 }
  0x22   : > { %614 = vmatpush3.bf16.msra.mxu1 %v613_v23  ;;  %p696_p5 = pnand %p695_p3, %p689_p0 }
  0x23   : > { %615 = vmatprep.subr.bf16.mxu1 %v766_v3 }
  0x26   : > { %617 = vmatpush3.bf16.msra.mxu1 %v616_v26 }
  0x27   : > { %618 = vmatprep.subr.bf16.mxu1 %v766_v3 }
  0x2a   : > { %620 = vmatpush3.bf16.msra.mxu1 %v619_v29 }
  0x2b   : > { %621 = vmatprep.subr.bf16.mxu1 %v766_v3 }
  0x2e   : > { %623 = vmatpush3.bf16.msra.mxu1 %v622_v32 }
  0xee   : > { %v298_v33 = vpop.f32.mrb[0].mxu0 }
  0xef   : > { %v521_v34 = vmul.f32 -1.442695, %v298_v33  ;;  %v558_v35 = vpop.f32.mrb[1].mxu0 }
  0xf1   : > { %682 = vpow2.f32 %v521_v34 }
  0xfb   : > { %v683_v36 = vpop.eup %682 }
  0xfc   : > { %v305_v37 = vadd.f32 1.0, %v683_v36 }
  0xfe   : > { %684 = vrcp.f32 %v305_v37 }
 0x108   : > { %v685_v38 = vpop.eup %684 }
 0x109   : > { %v308_v39 = vmul.f32 %v685_v38, %v298_v33 }
 0x10b   : > { %592 = vmatmul.mubr.f32.vlgmr.msra.gmra.mrb[0].mxu1 %v308_v39 }
 0x1de   : > { %v392_v41 = vpop.f32.mrb[0].mxu1 }
 0x1df   : > { %v396_v42 = vadd.f32 %v392_v41, %v309_v40  ;;  %v593_v43 = vpop.f32.mrb[1].mxu1 }
 0x1e1   : > { %397 = vst.msk [vmem:[%s868_s21] sm:$0xff] %vm221_vm1, %v396_v42 }
 0x1e2   : > { %699 = shalt.err (!%p696_p5)
}
 0x1e3   : > { %s700_s7 = scalar_lea.hbm %s924_s4, 128  ;;  %s704_s11 = scalar_lea.hbm %s978_s3, 256 }
 0x1e4   : > { %p701_p6 = scmp.ne.s32.totalorder %s924_s4, %s700_s7  ;;  %p705_p10 = scmp.lt.u32.totalorder %s924_s4, %s978_s3 }
 0x1e5   : > { %p706_p11 = scmp.lt.u32.totalorder %s704_s11, %s700_s7  ;;  %p708_p13 = scmp.lt.u32.totalorder %s700_s7, %s924_s4 }
 0x1e6   : > { %p702_p7 = pnand %p701_p6, %p830_p4 }
 0x1e7   : > { %p707_p12 = por %p706_p11, %p705_p10 }
 0x1e8   : > { %p703_p9 = pneg %p702_p7 }
 0x1e9   : > { %p709_p0 = por %p708_p13, %p707_p12 }
 0x1eb   : > { %p710_p1 = pnand %p709_p0, %p703_p9 }
 0x1ed   : > { %713 = shalt.err (!%p710_p1)
}
 0x1ee   : > { %624 = dma.vmem_to_hbm [thread:$0]  (%p830_p4), %s926_s28, 128, %s924_s4, %s399_s5  }
 0x1ef PF: > { %p630_p2 = scmp.ge.s32.totalorder %s764_s17, 2  ;;  %s424_s23 = sand.u32 1, %s744_s12  }
 0x1f0   : > { %s425_s26 = scalar_lea.sflag [#allocation3], %s424_s23 }
 0x1f1   : > { %p627_p3 = pnand %p630_p2, %p837_p8 }
 0x1f3   : > { %739 = dma.done.wait (!%p627_p3), %s425_s26, 128  }
 0x1f4   : > { %741 = vsyncadd (!%p627_p3), %s425_s26, 4294967168  ;;  %s16_s17 = sadd.s32 1, %s764_s17   ;;  %s981_s12 = smov %s748_s13 }
 0x1f5   : > { %p13_p5 = scmp.ge.s32.totalorder %s16_s17, 4   ;;  %s982_s13 = smov %s752_s14 }
 0x1f6   : > { %s983_s14 = smov %s843_s25  ;;  %s984_s15 = smov %s760_s16 }
 0x1f7   : > { %s985_s16 = smov %s987_s20  ;;  %15 = sbr.rel (!%p13_p5) target bundleno = 4 (0x4), region = 77 }
 0x1fe   :  { %430 = vsyncpa [#allocation3], 1 }
 0x1ff   :  { %432 = vsyncpa [#allocation3 + $0x1], 1 }

</bundles_post_ra>
